<compile_context>
chip_gen: v7x
topology: tpu7x:2x2x1
jax: 0.10.0
libtpu: 0.0.40
codegen_flags: <defaults>
</compile_context>

<pallas_src>
import functools

import jax
import jax.numpy as jnp
from jax import lax
from jax.experimental import pallas as pl
from jax.experimental.pallas import tpu as pltpu

LN_EPS = 1e-5


def _round_up(x, m):
    return (x + m - 1) // m * m


def _tpu_config():
    """(lane_align, vmem_cap_bytes, cores_per_chip) by TPU generation."""
    lane_align, vmem_cap, cores = 128, 56 << 20, 1   # conservative default
    try:
        kind = jax.devices()[0].device_kind.lower()
    except Exception:
        return lane_align, vmem_cap, cores
    if "v7" in kind:
        lane_align, vmem_cap, cores = 256, 48 << 20, 2    # 64 MiB VMEM / TC, 2 TCs
    elif "v6" in kind:
        lane_align, vmem_cap, cores = 256, 100 << 20, 1   # 128 MiB VMEM
    elif "v5e" in kind or "v5 lite" in kind or "v5lite" in kind:
        lane_align, vmem_cap, cores = 128, 100 << 20, 1   # 128 MiB VMEM
    elif "v4" in kind or "v5" in kind:
        lane_align, vmem_cap, cores = 128, 96 << 20, 2    # megacore
    return lane_align, vmem_cap, cores


def _pad_dim(n, lane_align):
    """Lane-dense feature size: 128 for small dims, lane_align for wide dims."""
    if n <= 128:
        return _round_up(n, 128)
    return _round_up(n, lane_align)


def _layernorm(h, gamma, beta, n_valid, n_pad):
    """LayerNorm over the last dim; statistics over the first n_valid lanes.

    Padded lanes of h are exactly zero by construction (zero-padded weight
    columns / biases), so plain sums give the correct statistics with no mask.
    gamma/beta are zero on padded lanes, so padded outputs stay exactly 0.
    """
    inv_n = 1.0 / float(n_valid)
    mu = jnp.sum(h, axis=-1, keepdims=True) * inv_n
    if n_valid == n_pad:
        d = h - mu
        var = jnp.sum(d * d, axis=-1, keepdims=True) * inv_n
    else:
        var = jnp.sum(h * h, axis=-1, keepdims=True) * inv_n - mu * mu
        var = jnp.maximum(var, 0.0)
    return (h - mu) * lax.rsqrt(var + LN_EPS) * gamma + beta


def resblock_kernel(x_ref,
                    w0_ref, b0_ref,
                    g1_ref, be1_ref, w1_ref, b1_ref,
                    g2_ref, be2_ref, w2_ref, b2_ref,
                    out_ref, *, n_valid, n_sub):
    n_pad = w0_ref.shape[-1]
    mm_dtype = w0_ref.dtype          # bf16 weights -> bf16 MXU inputs, f32 acc
    tm = x_ref.shape[0]
    sub = tm // n_sub

    w0, b0 = w0_ref[...], b0_ref[...]
    g1, be1 = g1_ref[...], be1_ref[...]
    w1, b1 = w1_ref[...], b1_ref[...]
    g2, be2 = g2_ref[...], be2_ref[...]
    w2, b2 = w2_ref[...], b2_ref[...]

    def one_chunk(xv):
        # linear0 (projection n_in -> n_out, present because n_in != n_out)
        seq = jnp.dot(xv.astype(mm_dtype), w0,
                      preferred_element_type=jnp.float32) + b0
        # norm1 -> ReLU -> linear1  (LN/ReLU in f32, matmul inputs in bf16)
        h = _layernorm(seq, g1, be1, n_valid, n_pad)
        h = jnp.maximum(h, 0.0).astype(mm_dtype)
        h = jnp.dot(h, w1, preferred_element_type=jnp.float32) + b1
        # norm2 -> ReLU -> linear2
        h = _layernorm(h, g2, be2, n_valid, n_pad)
        h = jnp.maximum(h, 0.0).astype(mm_dtype)
        h = jnp.dot(h, w2, preferred_element_type=jnp.float32) + b2
        return seq + h

    # Static split into independent row sub-chunks: lets the scheduler overlap
    # the LN/ReLU/cast of one chunk with the MXU matmuls of another.
    for s in range(n_sub):
        rows = pl.ds(s * sub, sub)
        val = one_chunk(x_ref[rows, :])
        if n_valid != n_pad:
            val = val[:, :n_valid]
        out_ref[rows, :] = val.astype(out_ref.dtype)


def prepare_params(params, *, mm_dtype=jnp.bfloat16, lane_align=None):
    """One-time padding + casting of the ResBlock parameters.

    Call once and reuse the result across forward calls: weights are cast to
    bf16 and feature dims padded to lane-dense multiples so the per-call
    wrapper does no parameter preprocessing at all.
    """
    if lane_align is None:
        lane_align, _, _ = _tpu_config()
    n_in, n_out = params["w0"].shape
    n_out_p = _pad_dim(n_out, lane_align)
    f32 = jnp.float32

    def pad2(a, rows, cols, dtype):
        a = a.astype(dtype)
        pr, pc = rows - a.shape[0], cols - a.shape[1]
        if pr or pc:
            a = jnp.pad(a, ((0, pr), (0, pc)))
        return a

    return dict(
        w0=pad2(params["w0"], n_in, n_out_p, mm_dtype),      # K dim left unpadded
        b0=pad2(params["b0"], 1, n_out_p, f32),
        g1=pad2(params["g1"], 1, n_out_p, f32),
        be1=pad2(params["be1"], 1, n_out_p, f32),
        w1=pad2(params["w1"], n_out_p, n_out_p, mm_dtype),
        b1=pad2(params["b1"], 1, n_out_p, f32),
        g2=pad2(params["g2"], 1, n_out_p, f32),
        be2=pad2(params["be2"], 1, n_out_p, f32),
        w2=pad2(params["w2"], n_out_p, n_out_p, mm_dtype),
        b2=pad2(params["b2"], 1, n_out_p, f32),
    )


@functools.partial(jax.jit, static_argnames=("n_out", "tm", "out_dtype"))
def resblock_pallas(x, prep, *, n_out, tm=None, out_dtype=None):
    """x: [..., n_in] (e.g. (batch, time, n_in)). prep: prepare_params output.

    Returns [..., n_out] in out_dtype (default x.dtype).
    """
    orig_shape = x.shape
    n_in = orig_shape[-1]
    x2 = x.reshape(-1, n_in)
    M = x2.shape[0]
    n_out_p = prep["w0"].shape[1]
    mm_dtype = prep["w0"].dtype
    out_dtype = x.dtype if out_dtype is None else out_dtype

    _, vmem_cap, cores = _tpu_config()

    # Row tile: multiple of 16 (bf16 packs 2 rows per sublane); larger default
    # on 128-MiB-VMEM parts to amortize per-grid-step overhead.
    tm_eff = tm if tm is not None else (512 if vmem_cap >= (96 << 20) else 256)
    tm_eff = min(tm_eff, _round_up(M, 16))
    grid_m = pl.cdiv(M, tm_eff)
    if cores >= 2 and grid_m == 1 and M >= 32:
        # Make sure both TensorCores get work on multi-core chips.
        tm_eff = _round_up(pl.cdiv(M, 2), 16)
        grid_m = pl.cdiv(M, tm_eff)

    # Sub-chunk the row tile inside the kernel when it is large enough.
    n_sub = 2 if (tm_eff >= 256 and tm_eff % 32 == 0) else 1

    row_in = pl.BlockSpec((tm_eff, n_in), lambda i: (i, 0))
    row_out = pl.BlockSpec((tm_eff, n_out), lambda i: (i, 0))
    # Grid-invariant weights / LN params: single-buffered and resident in VMEM.
    # TODO(synk): for very wide layers (n_out_p >= ~4096 bf16) resident w1/w2 no
    # longer fit VMEM (esp. v7x's 64 MiB/TC with both TCs holding a copy);
    # stream K-blocks via pltpu.emit_pipeline or a second "arbitrary" grid axis
    # with an f32 accumulator scratch.
    resident = lambda shape: pl.BlockSpec(shape, lambda i: (0,) * len(shape),
                                          pipeline_mode=pl.Buffered(1))

    # VMEM budget: single-buffered weights (counted once) + double-buffered row
    # tiles + f32 intermediates headroom, clamped under the generation cap.
    itemsize_mm = jnp.dtype(mm_dtype).itemsize
    ws_bytes = (prep["w0"].size + prep["w1"].size + prep["w2"].size) * itemsize_mm
    vec_bytes = 7 * n_out_p * 4
    io_bytes = (2 * tm_eff * n_in * x2.dtype.itemsize
                + 2 * tm_eff * n_out * jnp.dtype(out_dtype).itemsize)
    inter_bytes = 3 * tm_eff * n_out_p * 4
    needed = ws_bytes + 2 * vec_bytes + io_bytes + inter_bytes + (4 << 20)
    vmem_limit = int(min(max(needed, 32 << 20), vmem_cap))

    flops = 2 * M * n_out_p * (n_in + 2 * n_out_p)
    bytes_accessed = (x2.size * x2.dtype.itemsize + ws_bytes + vec_bytes
                      + M * n_out * jnp.dtype(out_dtype).itemsize)

    out = pl.pallas_call(
        functools.partial(resblock_kernel, n_valid=n_out, n_sub=n_sub),
        out_shape=jax.ShapeDtypeStruct((M, n_out), out_dtype),
        grid_spec=pltpu.PrefetchScalarGridSpec(
            num_scalar_prefetch=0,
            grid=(grid_m,),
            in_specs=[
                row_in,                                                 # x
                resident(prep["w0"].shape), resident(prep["b0"].shape),   # linear0
                resident(prep["g1"].shape), resident(prep["be1"].shape),  # LN1
                resident(prep["w1"].shape), resident(prep["b1"].shape),   # linear1
                resident(prep["g2"].shape), resident(prep["be2"].shape),  # LN2
                resident(prep["w2"].shape), resident(prep["b2"].shape),   # linear2
            ],
            out_specs=row_out,
        ),
        compiler_params=pltpu.CompilerParams(
            dimension_semantics=("parallel",),   # M axis shards across TCs
            vmem_limit_bytes=vmem_limit,
        ),
        cost_estimate=pl.CostEstimate(flops=flops, transcendentals=2 * M,
                                      bytes_accessed=bytes_accessed),
    )(x2, prep["w0"], prep["b0"], prep["g1"], prep["be1"], prep["w1"], prep["b1"],
      prep["g2"], prep["be2"], prep["w2"], prep["b2"])

    return out.reshape(orig_shape[:-1] + (n_out,))


def init_params(key, n_in, n_out):
    """Deterministic parameter init mirroring the PyTorch module's __init__."""
    ks = jax.random.split(key, 6)

    # linear0: PyTorch default init style.
    bound0 = 1.0 / jnp.sqrt(n_in)
    w0 = jax.random.uniform(ks[0], (n_in, n_out), jnp.float32, -bound0, bound0)
    b0 = jax.random.uniform(ks[1], (1, n_out), jnp.float32, -bound0, bound0)

    # linear1 / linear2: kaiming_normal_(fan_in, relu) => std = sqrt(2 / fan_in)
    std = jnp.sqrt(2.0 / n_out)
    w1 = std * jax.random.normal(ks[2], (n_out, n_out), jnp.float32)
    w2 = std * jax.random.normal(ks[3], (n_out, n_out), jnp.float32)
    bound = 1.0 / jnp.sqrt(n_out)
    b1 = jax.random.uniform(ks[4], (1, n_out), jnp.float32, -bound, bound)
    b2 = jax.random.uniform(ks[5], (1, n_out), jnp.float32, -bound, bound)

    # LayerNorm params: PyTorch default gamma=1, beta=0
    g1 = jnp.ones((1, n_out), jnp.float32)
    be1 = jnp.zeros((1, n_out), jnp.float32)
    g2 = jnp.ones((1, n_out), jnp.float32)
    be2 = jnp.zeros((1, n_out), jnp.float32)

    return dict(w0=w0, b0=b0, g1=g1, be1=be1, w1=w1, b1=b1,
                g2=g2, be2=be2, w2=w2, b2=b2)


def _ln_ref(h, gamma, beta):
    mu = jnp.mean(h, axis=-1, keepdims=True)
    var = jnp.mean((h - mu) ** 2, axis=-1, keepdims=True)
    return (h - mu) * lax.rsqrt(var + LN_EPS) * gamma + beta


def resblock_ref(x, p, mm_dtype=None):
    """Pure-JAX reference. mm_dtype=bf16 mirrors the kernel's MXU precision."""
    def mm(a, w):
        if mm_dtype is not None:
            a = a.astype(mm_dtype)
            w = w.astype(mm_dtype)
        return jnp.dot(a, w, preferred_element_type=jnp.float32)

    seq = mm(x, p["w0"]) + p["b0"]
    h = jnp.maximum(_ln_ref(seq, p["g1"], p["be1"]), 0.0)
    h = mm(h, p["w1"]) + p["b1"]
    h = jnp.maximum(_ln_ref(h, p["g2"], p["be2"]), 0.0)
    h = mm(h, p["w2"]) + p["b2"]
    return seq + h


if __name__ == "__main__":
    B, T, n_in, n_out = 2, 8, 16, 32   # batch=2, seq=8, hidden 16 -> 32

    key = jax.random.PRNGKey(0)
    kx, kp = jax.random.split(key)
    x_bt = jax.random.normal(kx, (B, T, n_in), jnp.float32)
    params = init_params(kp, n_in, n_out)

    prep = prepare_params(params)                       # one-time pad + bf16 cast
    out = resblock_pallas(x_bt, prep, n_out=n_out)      # acts on (batch, time, feat)
    out = jax.block_until_ready(out)
    assert out.shape == (B, T, n_out)

    # Tight check vs. reference with identical bf16-matmul / f32-accumulate math.
    ref_bf16 = resblock_ref(x_bt, params, mm_dtype=jnp.bfloat16)
    assert jnp.allclose(out, ref_bf16, atol=1e-2, rtol=1e-2), \
        float(jnp.max(jnp.abs(out - ref_bf16)))

    # Loose sanity check vs. the full-f32 PyTorch-equivalent math.
    ref_f32 = resblock_ref(x_bt, params)
    assert jnp.allclose(out, ref_f32, atol=1.5e-1, rtol=1e-1), \
        float(jnp.max(jnp.abs(out - ref_f32)))

    print("KERNEL_OK")
</pallas_src>

<mosaic_0001>
module attributes {stable_mosaic.version = 11 : i64} {
  func.func @resblock_kernel(%arg0: i32, %arg1: memref<16x16xf32, #tpu.memory_space<vmem>>, %arg2: memref<16x128xbf16, #tpu.memory_space<vmem>>, %arg3: memref<1x128xf32, #tpu.memory_space<vmem>>, %arg4: memref<1x128xf32, #tpu.memory_space<vmem>>, %arg5: memref<1x128xf32, #tpu.memory_space<vmem>>, %arg6: memref<128x128xbf16, #tpu.memory_space<vmem>>, %arg7: memref<1x128xf32, #tpu.memory_space<vmem>>, %arg8: memref<1x128xf32, #tpu.memory_space<vmem>>, %arg9: memref<1x128xf32, #tpu.memory_space<vmem>>, %arg10: memref<128x128xbf16, #tpu.memory_space<vmem>>, %arg11: memref<1x128xf32, #tpu.memory_space<vmem>>, %arg12: memref<16x32xf32, #tpu.memory_space<vmem>>) attributes {dimension_semantics = [#tpu.dimension_semantics<parallel>], iteration_bounds = array<i64: 1>, scalar_prefetch = 0 : i64, scratch_operands = 0 : i64, tpu.core_type = #tpu.core_type<tc>, window_params = [{transform_indices = @transform_0, window_bounds = array<i64: 16, 16>}, {pipeline_mode = #tpu.pipeline_mode<synchronous>, transform_indices = @transform_1, window_bounds = array<i64: 16, 128>}, {pipeline_mode = #tpu.pipeline_mode<synchronous>, transform_indices = @transform_2, window_bounds = array<i64: 1, 128>}, {pipeline_mode = #tpu.pipeline_mode<synchronous>, transform_indices = @transform_3, window_bounds = array<i64: 1, 128>}, {pipeline_mode = #tpu.pipeline_mode<synchronous>, transform_indices = @transform_4, window_bounds = array<i64: 1, 128>}, {pipeline_mode = #tpu.pipeline_mode<synchronous>, transform_indices = @transform_5, window_bounds = array<i64: 128, 128>}, {pipeline_mode = #tpu.pipeline_mode<synchronous>, transform_indices = @transform_6, window_bounds = array<i64: 1, 128>}, {pipeline_mode = #tpu.pipeline_mode<synchronous>, transform_indices = @transform_7, window_bounds = array<i64: 1, 128>}, {pipeline_mode = #tpu.pipeline_mode<synchronous>, transform_indices = @transform_8, window_bounds = array<i64: 1, 128>}, {pipeline_mode = #tpu.pipeline_mode<synchronous>, transform_indices = @transform_9, window_bounds = array<i64: 128, 128>}, {pipeline_mode = #tpu.pipeline_mode<synchronous>, transform_indices = @transform_10, window_bounds = array<i64: 1, 128>}, {transform_indices = @transform_11, window_bounds = array<i64: 16, 32>}]} {
    %c0 = arith.constant 0 : index
    %c0_0 = arith.constant 0 : index
    %0 = vector.load %arg2[%c0, %c0_0] : memref<16x128xbf16, #tpu.memory_space<vmem>>, vector<16x128xbf16>
    %c0_1 = arith.constant 0 : index
    %c0_2 = arith.constant 0 : index
    %1 = vector.load %arg3[%c0_1, %c0_2] : memref<1x128xf32, #tpu.memory_space<vmem>>, vector<1x128xf32>
    %c0_3 = arith.constant 0 : index
    %c0_4 = arith.constant 0 : index
    %2 = vector.load %arg4[%c0_3, %c0_4] : memref<1x128xf32, #tpu.memory_space<vmem>>, vector<1x128xf32>
    %c0_5 = arith.constant 0 : index
    %c0_6 = arith.constant 0 : index
    %3 = vector.load %arg5[%c0_5, %c0_6] : memref<1x128xf32, #tpu.memory_space<vmem>>, vector<1x128xf32>
    %c0_7 = arith.constant 0 : index
    %c0_8 = arith.constant 0 : index
    %4 = vector.load %arg6[%c0_7, %c0_8] : memref<128x128xbf16, #tpu.memory_space<vmem>>, vector<128x128xbf16>
    %c0_9 = arith.constant 0 : index
    %c0_10 = arith.constant 0 : index
    %5 = vector.load %arg7[%c0_9, %c0_10] : memref<1x128xf32, #tpu.memory_space<vmem>>, vector<1x128xf32>
    %c0_11 = arith.constant 0 : index
    %c0_12 = arith.constant 0 : index
    %6 = vector.load %arg8[%c0_11, %c0_12] : memref<1x128xf32, #tpu.memory_space<vmem>>, vector<1x128xf32>
    %c0_13 = arith.constant 0 : index
    %c0_14 = arith.constant 0 : index
    %7 = vector.load %arg9[%c0_13, %c0_14] : memref<1x128xf32, #tpu.memory_space<vmem>>, vector<1x128xf32>
    %c0_15 = arith.constant 0 : index
    %c0_16 = arith.constant 0 : index
    %8 = vector.load %arg10[%c0_15, %c0_16] : memref<128x128xbf16, #tpu.memory_space<vmem>>, vector<128x128xbf16>
    %c0_17 = arith.constant 0 : index
    %c0_18 = arith.constant 0 : index
    %9 = vector.load %arg11[%c0_17, %c0_18] : memref<1x128xf32, #tpu.memory_space<vmem>>, vector<1x128xf32>
    %c0_19 = arith.constant 0 : index
    %c0_20 = arith.constant 0 : index
    %10 = vector.load %arg1[%c0_19, %c0_20] : memref<16x16xf32, #tpu.memory_space<vmem>>, vector<16x16xf32>
    %11 = arith.truncf %10 : vector<16x16xf32> to vector<16x16xbf16>
    %cst = arith.constant dense<0.000000e+00> : vector<16x128xf32>
    %12 = tpu.matmul %11, %0, %cst {dimension_numbers = #tpu.dot_dimension_numbers<[1], [0], [0], [1], [0, 0, 1, 1], [], []>} : vector<16x16xbf16>, vector<16x128xbf16>, vector<16x128xf32> -> vector<16x128xf32>
    %13 = vector.broadcast %1 : vector<1x128xf32> to vector<16x128xf32>
    %14 = arith.addf %12, %13 : vector<16x128xf32>
    %cst_21 = arith.constant dense<0.000000e+00> : vector<16xf32>
    %15 = vector.multi_reduction <add>, %14, %cst_21 [1] : vector<16x128xf32> to vector<16xf32>
    %16 = vector.shape_cast %15 : vector<16xf32> to vector<16x1xf32>
    %cst_22 = arith.constant 3.125000e-02 : f32
    %17 = vector.broadcast %cst_22 : f32 to vector<16x1xf32>
    %18 = arith.mulf %16, %17 : vector<16x1xf32>
    %19 = arith.mulf %14, %14 : vector<16x128xf32>
    %cst_23 = arith.constant dense<0.000000e+00> : vector<16xf32>
    %20 = vector.multi_reduction <add>, %19, %cst_23 [1] : vector<16x128xf32> to vector<16xf32>
    %21 = vector.shape_cast %20 : vector<16xf32> to vector<16x1xf32>
    %cst_24 = arith.constant 3.125000e-02 : f32
    %22 = vector.broadcast %cst_24 : f32 to vector<16x1xf32>
    %23 = arith.mulf %21, %22 : vector<16x1xf32>
    %24 = arith.mulf %18, %18 : vector<16x1xf32>
    %25 = arith.subf %23, %24 : vector<16x1xf32>
    %cst_25 = arith.constant 0.000000e+00 : f32
    %26 = vector.broadcast %cst_25 : f32 to vector<16x1xf32>
    %27 = arith.maximumf %25, %26 : vector<16x1xf32>
    %28 = vector.broadcast %18 : vector<16x1xf32> to vector<16x128xf32>
    %29 = arith.subf %14, %28 : vector<16x128xf32>
    %cst_26 = arith.constant 9.99999974E-6 : f32
    %30 = vector.broadcast %cst_26 : f32 to vector<16x1xf32>
    %31 = arith.addf %27, %30 : vector<16x1xf32>
    %32 = math.rsqrt %31 : vector<16x1xf32>
    %33 = vector.broadcast %32 : vector<16x1xf32> to vector<16x128xf32>
    %34 = arith.mulf %29, %33 : vector<16x128xf32>
    %35 = vector.broadcast %2 : vector<1x128xf32> to vector<16x128xf32>
    %36 = arith.mulf %34, %35 : vector<16x128xf32>
    %37 = vector.broadcast %3 : vector<1x128xf32> to vector<16x128xf32>
    %38 = arith.addf %36, %37 : vector<16x128xf32>
    %cst_27 = arith.constant 0.000000e+00 : f32
    %39 = vector.broadcast %cst_27 : f32 to vector<16x128xf32>
    %40 = arith.maximumf %38, %39 : vector<16x128xf32>
    %41 = arith.truncf %40 : vector<16x128xf32> to vector<16x128xbf16>
    %cst_28 = arith.constant dense<0.000000e+00> : vector<16x128xf32>
    %42 = tpu.matmul %41, %4, %cst_28 {dimension_numbers = #tpu.dot_dimension_numbers<[1], [0], [0], [1], [0, 0, 1, 1], [], []>} : vector<16x128xbf16>, vector<128x128xbf16>, vector<16x128xf32> -> vector<16x128xf32>
    %43 = vector.broadcast %5 : vector<1x128xf32> to vector<16x128xf32>
    %44 = arith.addf %42, %43 : vector<16x128xf32>
    %cst_29 = arith.constant dense<0.000000e+00> : vector<16xf32>
    %45 = vector.multi_reduction <add>, %44, %cst_29 [1] : vector<16x128xf32> to vector<16xf32>
    %46 = vector.shape_cast %45 : vector<16xf32> to vector<16x1xf32>
    %cst_30 = arith.constant 3.125000e-02 : f32
    %47 = vector.broadcast %cst_30 : f32 to vector<16x1xf32>
    %48 = arith.mulf %46, %47 : vector<16x1xf32>
    %49 = arith.mulf %44, %44 : vector<16x128xf32>
    %cst_31 = arith.constant dense<0.000000e+00> : vector<16xf32>
    %50 = vector.multi_reduction <add>, %49, %cst_31 [1] : vector<16x128xf32> to vector<16xf32>
    %51 = vector.shape_cast %50 : vector<16xf32> to vector<16x1xf32>
    %cst_32 = arith.constant 3.125000e-02 : f32
    %52 = vector.broadcast %cst_32 : f32 to vector<16x1xf32>
    %53 = arith.mulf %51, %52 : vector<16x1xf32>
    %54 = arith.mulf %48, %48 : vector<16x1xf32>
    %55 = arith.subf %53, %54 : vector<16x1xf32>
    %cst_33 = arith.constant 0.000000e+00 : f32
    %56 = vector.broadcast %cst_33 : f32 to vector<16x1xf32>
    %57 = arith.maximumf %55, %56 : vector<16x1xf32>
    %58 = vector.broadcast %48 : vector<16x1xf32> to vector<16x128xf32>
    %59 = arith.subf %44, %58 : vector<16x128xf32>
    %cst_34 = arith.constant 9.99999974E-6 : f32
    %60 = vector.broadcast %cst_34 : f32 to vector<16x1xf32>
    %61 = arith.addf %57, %60 : vector<16x1xf32>
    %62 = math.rsqrt %61 : vector<16x1xf32>
    %63 = vector.broadcast %62 : vector<16x1xf32> to vector<16x128xf32>
    %64 = arith.mulf %59, %63 : vector<16x128xf32>
    %65 = vector.broadcast %6 : vector<1x128xf32> to vector<16x128xf32>
    %66 = arith.mulf %64, %65 : vector<16x128xf32>
    %67 = vector.broadcast %7 : vector<1x128xf32> to vector<16x128xf32>
    %68 = arith.addf %66, %67 : vector<16x128xf32>
    %cst_35 = arith.constant 0.000000e+00 : f32
    %69 = vector.broadcast %cst_35 : f32 to vector<16x128xf32>
    %70 = arith.maximumf %68, %69 : vector<16x128xf32>
    %71 = arith.truncf %70 : vector<16x128xf32> to vector<16x128xbf16>
    %cst_36 = arith.constant dense<0.000000e+00> : vector<16x128xf32>
    %72 = tpu.matmul %71, %8, %cst_36 {dimension_numbers = #tpu.dot_dimension_numbers<[1], [0], [0], [1], [0, 0, 1, 1], [], []>} : vector<16x128xbf16>, vector<128x128xbf16>, vector<16x128xf32> -> vector<16x128xf32>
    %73 = vector.broadcast %9 : vector<1x128xf32> to vector<16x128xf32>
    %74 = arith.addf %72, %73 : vector<16x128xf32>
    %75 = arith.addf %14, %74 : vector<16x128xf32>
    %76 = vector.extract_strided_slice %75 {offsets = [0, 0], sizes = [16, 32], strides = [1, 1]} : vector<16x128xf32> to vector<16x32xf32>
    %c0_37 = arith.constant 0 : index
    %c0_38 = arith.constant 0 : index
    %77 = vector.load %arg12[%c0_37, %c0_38] : memref<16x32xf32, #tpu.memory_space<vmem>>, vector<16x32xf32>
    tpu.vector_store %arg12[%c0_37, %c0_38], %76 {strides = array<i32>} : memref<16x32xf32, #tpu.memory_space<vmem>>, vector<16x32xf32>,
    return
  }
  func.func @transform_0(%arg0: i32) -> (i32, i32) {
    %c0_i32 = arith.constant 0 : i32
    %c0_i32_0 = arith.constant 0 : i32
    return %arg0, %c0_i32 : i32, i32
  }
  func.func @transform_1(%arg0: i32) -> (i32, i32) {
    %c0_i32 = arith.constant 0 : i32
    %c0_i32_0 = arith.constant 0 : i32
    %c0_i32_1 = arith.constant 0 : i32
    return %c0_i32, %c0_i32_0 : i32, i32
  }
  func.func @transform_2(%arg0: i32) -> (i32, i32) {
    %c0_i32 = arith.constant 0 : i32
    %c0_i32_0 = arith.constant 0 : i32
    %c0_i32_1 = arith.constant 0 : i32
    return %c0_i32, %c0_i32_0 : i32, i32
  }
  func.func @transform_3(%arg0: i32) -> (i32, i32) {
    %c0_i32 = arith.constant 0 : i32
    %c0_i32_0 = arith.constant 0 : i32
    %c0_i32_1 = arith.constant 0 : i32
    return %c0_i32, %c0_i32_0 : i32, i32
  }
  func.func @transform_4(%arg0: i32) -> (i32, i32) {
    %c0_i32 = arith.constant 0 : i32
    %c0_i32_0 = arith.constant 0 : i32
    %c0_i32_1 = arith.constant 0 : i32
    return %c0_i32, %c0_i32_0 : i32, i32
  }
  func.func @transform_5(%arg0: i32) -> (i32, i32) {
    %c0_i32 = arith.constant 0 : i32
    %c0_i32_0 = arith.constant 0 : i32
    %c0_i32_1 = arith.constant 0 : i32
    return %c0_i32, %c0_i32_0 : i32, i32
  }
  func.func @transform_6(%arg0: i32) -> (i32, i32) {
    %c0_i32 = arith.constant 0 : i32
    %c0_i32_0 = arith.constant 0 : i32
    %c0_i32_1 = arith.constant 0 : i32
    return %c0_i32, %c0_i32_0 : i32, i32
  }
  func.func @transform_7(%arg0: i32) -> (i32, i32) {
    %c0_i32 = arith.constant 0 : i32
    %c0_i32_0 = arith.constant 0 : i32
    %c0_i32_1 = arith.constant 0 : i32
    return %c0_i32, %c0_i32_0 : i32, i32
  }
  func.func @transform_8(%arg0: i32) -> (i32, i32) {
    %c0_i32 = arith.constant 0 : i32
    %c0_i32_0 = arith.constant 0 : i32
    %c0_i32_1 = arith.constant 0 : i32
    return %c0_i32, %c0_i32_0 : i32, i32
  }
  func.func @transform_9(%arg0: i32) -> (i32, i32) {
    %c0_i32 = arith.constant 0 : i32
    %c0_i32_0 = arith.constant 0 : i32
    %c0_i32_1 = arith.constant 0 : i32
    return %c0_i32, %c0_i32_0 : i32, i32
  }
  func.func @transform_10(%arg0: i32) -> (i32, i32) {
    %c0_i32 = arith.constant 0 : i32
    %c0_i32_0 = arith.constant 0 : i32
    %c0_i32_1 = arith.constant 0 : i32
    return %c0_i32, %c0_i32_0 : i32, i32
  }
  func.func @transform_11(%arg0: i32) -> (i32, i32) {
    %c0_i32 = arith.constant 0 : i32
    %c0_i32_0 = arith.constant 0 : i32
    return %arg0, %c0_i32 : i32, i32
  }
}

</mosaic_0001>

<bundles_post_ra>
// kernel: resblock_pallas.1
= control target key start
LH: loop header
LB: loop body
LE: loop exit
PB: predicated region body
PF: predicated region fallthrough
CT: control target
= control target key end

     0   :  { %16 = vsyncpa [#allocation3], 0  ;;  %s897_s0 = inlined_call_operand.hbm [shape: f32[16,16], index: 0, kind: input, shape index: {}]   ;;  %s898_s1 = inlined_call_operand.vmem [shape: bf16[16,128], index: 1, kind: input, shape index: {}]   ;;  %s899_s2 = inlined_call_operand.vmem [shape: f32[1,128], index: 2, kind: input, shape index: {}]   ;;  %s900_s3 = inlined_call_operand.vmem [shape: f32[1,128], index: 3, kind: input, shape index: {}]   ;;  %s901_s4 = inlined_call_operand.vmem [shape: f32[1,128], index: 4, kind: input, shape index: {}]   ;;  %s902_s5 = inlined_call_operand.hbm [shape: bf16[128,128], index: 5, kind: input, shape index: {}]   ;;  %s903_s6 = inlined_call_operand.vmem [shape: f32[1,128], index: 6, kind: input, shape index: {}]   ;;  %s904_s7 = inlined_call_operand.vmem [shape: f32[1,128], index: 7, kind: input, shape index: {}]   ;;  %s905_s8 = inlined_call_operand.vmem [shape: f32[1,128], index: 8, kind: input, shape index: {}]   ;;  %s906_s9 = inlined_call_operand.hbm [shape: bf16[128,128], index: 9, kind: input, shape index: {}]   ;;  %s907_s10 = inlined_call_operand.vmem [shape: f32[1,128], index: 10, kind: input, shape index: {}]   ;;  %s908_s11 = inlined_call_operand.hbm [shape: f32[16,32], index: 11, kind: output, shape index: {}]  }
   0x1   :  { %17 = vsyncpa [#allocation6], 0 }
   0x2   :  { %18 = vsyncpa [#allocation4], 0  ;;  %s709_s17 = smov [#allocation5]   ;;  %s615_s21 = scalar_lea.hbm %s902_s5, 1024 }
   0x3   :  { %s44_s18 = sshll.u32 %s709_s17, 4  ;;  %p616_p0 = scmp.ne.s32.totalorder %s902_s5, %s615_s21  ;;  %s45_s18 = int_to_ptr.vmem [resolvable:$true] %s44_s18 }
   0x4   :  { %p619_p1 = scmp.lt.u32.totalorder %s615_s21, %s902_s5 }
   0x6   :  { %p621_p2 = pnand %p619_p1, %p616_p0 }
   0x8   :  { %624 = shalt.err (!%p621_p2)
}
   0x9   :  { %s625_s26 = scalar_lea.vmem %s45_s18, 1024  ;;  %p630_p4 = scmp.lt.s32.totalorder %s45_s18, %s45_s18 }
   0xa   :  { %p626_p3 = scmp.ne.s32.totalorder %s45_s18, %s625_s26  ;;  %p631_p5 = scmp.lt.s32.totalorder %s625_s26, %s625_s26 }
   0xc   :  { %p632_p6 = por %p631_p5, %p630_p4 }
   0xe   :  { %p633_p7 = pnand %p632_p6, %p626_p3 }
  0x10   :  { %636 = shalt.err (!%p633_p7)
}
  0x11   :  { %s710_s27 = smov 64   ;;  %s711_s28 = smov 4  }
  0x12   :  { %50 = dma.hbm_to_vmem [thread:$0]  %s902_s5, 1024, %s45_s18, [#allocation6], %s710_s27, %s710_s27, %s711_s28  }
  0x13   :  { %s712_s12 = smov [#allocation2]   ;;  %s637_s16 = scalar_lea.hbm %s897_s0, 256 }
  0x14   :  { %s24_s13 = sshll.u32 %s712_s12, 4  ;;  %p638_p8 = scmp.ne.s32.totalorder %s897_s0, %s637_s16  ;;  %s25_s13 = int_to_ptr.vmem [resolvable:$true] %s24_s13 }
  0x15   :  { %p641_p9 = scmp.lt.u32.totalorder %s637_s16, %s897_s0 }
  0x17   :  { %p643_p10 = pnand %p641_p9, %p638_p8 }
  0x19   :  { %646 = shalt.err (!%p643_p10)
}
  0x1a   :  { %s647_s22 = scalar_lea.vmem %s25_s13, 256  ;;  %p652_p12 = scmp.lt.s32.totalorder %s25_s13, %s25_s13 }
  0x1b   :  { %p648_p11 = scmp.ne.s32.totalorder %s25_s13, %s647_s22  ;;  %p653_p13 = scmp.lt.s32.totalorder %s647_s22, %s647_s22 }
  0x1d   :  { %p654_p0 = por %p653_p13, %p652_p12 }
  0x1f   :  { %p655_p1 = pnand %p654_p0, %p648_p11 }
  0x21   :  { %658 = shalt.err (!%p655_p1)
}
  0x22   :  { %s713_s5 = smov 128   ;;  %s714_s18 = smov 8  }
  0x23   :  { %30 = dma.hbm_to_vmem [thread:$0]  %s897_s0, 256, %s25_s13, [#allocation3], %s713_s5, %s713_s5, %s714_s18  }
  0x24   :  { %s715_s25 = smov [#allocation7]   ;;  %s659_s12 = scalar_lea.hbm %s906_s9, 1024 }
  0x25   :  { %s62_s26 = sshll.u32 %s715_s25, 4  ;;  %p660_p2 = scmp.ne.s32.totalorder %s906_s9, %s659_s12  ;;  %s63_s26 = int_to_ptr.vmem [resolvable:$true] %s62_s26 }
  0x26   :  { %p663_p3 = scmp.lt.u32.totalorder %s659_s12, %s906_s9 }
  0x28   :  { %p665_p4 = pnand %p663_p3, %p660_p2 }
  0x2a   :  { %668 = shalt.err (!%p665_p4)
}
  0x2b   :  { %s669_s19 = scalar_lea.vmem %s63_s26, 1024  ;;  %p674_p6 = scmp.lt.s32.totalorder %s63_s26, %s63_s26 }
  0x2c   :  { %p670_p5 = scmp.ne.s32.totalorder %s63_s26, %s669_s19  ;;  %p675_p7 = scmp.lt.s32.totalorder %s669_s19, %s669_s19 }
  0x2e   :  { %p676_p8 = por %p675_p7, %p674_p6 }
  0x30   :  { %p677_p9 = pnand %p676_p8, %p670_p5 }
  0x32   :  { %680 = shalt.err (!%p677_p9)
}
  0x33   :  { %68 = dma.hbm_to_vmem [thread:$0]  %s906_s9, 1024, %s63_s26, [#allocation6], %s710_s27, %s710_s27, %s711_s28  }
  0x34   :  { %703 = dma.done.wait [#allocation3], 256  }
  0x35   :  { %704 = vsyncadd [#allocation3], 4294967040 }
  0x36   :  { %705 = dma.done.wait [#allocation6], 2048  }
  0x37   :  { %706 = vsyncadd [#allocation6], 4294965248  ;;  %v716_v0 = vmov 0.0   ;;  %vm717_vm0 = vmmov 0   ;;  %v590_v1 = vld [vmem:[%s898_s1] sm:$0xff]   ;;  %v123_v3 = vld [vmem:[#allocation2 + $0x8] sm:$0xff] }
  0x38   :  { %534 = vmatprep.subr.bf16.mxu0 %v716_v0  ;;  %536 = vmatprep.mubr.msk.bf16.mxu0 %vm717_vm0, %v716_v0  ;;  %v122_v2 = vld [vmem:[#allocation2] sm:$0xff]  ;;  %vm137_vm1 = vcmask 130048   ;;  %v591_v14 = vld [vmem:[#allocation5] sm:$0xff]   ;;  %v592_v15 = vld [vmem:[#allocation5 + $0x8] sm:$0xff]   ;;  %vm468_vm2 = vcmask 261120  }
  0x39   :  { %540 = vmatprep.subr.bf16.mxu1 %v716_v0  ;;  %556 = vmatprep.mubr.msk.bf16.mxu1 %vm717_vm0, %v716_v0  ;;  %v124_v4 = vpack.c.bf16 %v123_v3, %v122_v2  ;;  %v489_v5 = vld [vmem:[%s899_s2] ss:$0 sm:$0xff]  ;;  %v594_v17 = vld [vmem:[#allocation5 + $0x18] sm:$0xff]   ;;  %v595_v18 = vld [vmem:[#allocation5 + $0x20] sm:$0xff]  }
  0x3a   :  { %535 = vmatpush3.bf16.msra.mxu0 %v590_v1  ;;  %541 = vmatpush3.bf16.msra.mxu1 %v591_v14  ;;  %v593_v16 = vld [vmem:[#allocation5 + $0x10] sm:$0xff]   ;;  %v596_v19 = vld [vmem:[#allocation5 + $0x28] sm:$0xff]   ;;  %v598_v21 = vld [vmem:[#allocation5 + $0x38] sm:$0xff]  }
  0x3b   :  { %560 = vmatprep.subr.bf16.mxu0 %v716_v0  ;;  %542 = vmatprep.subr.bf16.mxu1 %v716_v0  ;;  %v597_v20 = vld [vmem:[#allocation5 + $0x30] sm:$0xff]   ;;  %v599_v62 = vld [vmem:[#allocation7] sm:$0xff]   ;;  %v600_v63 = vld [vmem:[#allocation7 + $0x8] sm:$0xff]  }
  0x3c   :  { %v492_v40 = vld [vmem:[%s900_s3] ss:$0 sm:$0xff]  ;;  %v602_v2 = vld [vmem:[#allocation7 + $0x18] sm:$0xff]   ;;  %v603_v3 = vld [vmem:[#allocation7 + $0x20] sm:$0xff]  }
  0x3d   :  { %537 = vmatmul.mubr.msk.bf16.vlgmr.msra.gmra.mrb[0].mxu0 %vm137_vm1, %v124_v4  ;;  %v493_v45 = vld [vmem:[%s901_s4] ss:$0 sm:$0xff]  ;;  %v604_v4 = vld [vmem:[#allocation7 + $0x28] sm:$0xff]  }
  0x3e   :  { %576 = vmatprep.mubr.msk.bf16.mxu0 %vm717_vm0, %v716_v0  ;;  %543 = vmatpush3.bf16.msra.mxu1 %v592_v15  ;;  %v494_v53 = vld [vmem:[%s903_s6] ss:$0 sm:$0xff] }
  0x3f   :  { %544 = vmatprep.subr.bf16.mxu1 %v716_v0  ;;  %561 = vmatpush3.bf16.msra.mxu0 %v599_v62  ;;  %v601_v1 = vld [vmem:[#allocation7 + $0x10] sm:$0xff]  }
  0x40   :  { %562 = vmatprep.subr.bf16.mxu0 %v716_v0 }
  0x42   :  { %545 = vmatpush3.bf16.msra.mxu1 %v593_v16 }
  0x43   :  { %546 = vmatprep.subr.bf16.mxu1 %v716_v0  ;;  %563 = vmatpush3.bf16.msra.mxu0 %v600_v63 }
  0x44   :  { %564 = vmatprep.subr.bf16.mxu0 %v716_v0 }
  0x46   :  { %547 = vmatpush3.bf16.msra.mxu1 %v594_v17 }
  0x47   :  { %548 = vmatprep.subr.bf16.mxu1 %v716_v0  ;;  %565 = vmatpush3.bf16.msra.mxu0 %v601_v1 }
  0x48   :  { %566 = vmatprep.subr.bf16.mxu0 %v716_v0 }
  0x4a   :  { %549 = vmatpush3.bf16.msra.mxu1 %v595_v18 }
  0x4b   :  { %550 = vmatprep.subr.bf16.mxu1 %v716_v0  ;;  %567 = vmatpush3.bf16.msra.mxu0 %v602_v2 }
  0x4c   :  { %568 = vmatprep.subr.bf16.mxu0 %v716_v0 }
  0x4e   :  { %551 = vmatpush3.bf16.msra.mxu1 %v596_v19 }
  0x4f   :  { %552 = vmatprep.subr.bf16.mxu1 %v716_v0  ;;  %569 = vmatpush3.bf16.msra.mxu0 %v603_v3 }
  0x50   :  { %570 = vmatprep.subr.bf16.mxu0 %v716_v0 }
  0x52   :  { %553 = vmatpush3.bf16.msra.mxu1 %v597_v20 }
  0x53   :  { %554 = vmatprep.subr.bf16.mxu1 %v716_v0  ;;  %571 = vmatpush3.bf16.msra.mxu0 %v604_v4 }
  0x54   :  { %572 = vmatprep.subr.bf16.mxu0 %v716_v0 }
  0x56   :  { %555 = vmatpush3.bf16.msra.mxu1 %v598_v21 }
 0x110   :  { %v175_v6 = vpop.f32.mrb[0].mxu0 }
 0x111   :  { %v836_v7 = vadd.f32 %v489_v5, %v175_v6  ;;  %v538_v8 = vpop.f32.mrb[1].mxu0  ;;  %v606_v6 = vld [vmem:[#allocation7 + $0x38] sm:$0xff]  }
 0x112   :  { %v178_v9 = vpop.f32.mrb[2].mxu0 }
 0x113   :  { %v838_v10 = vadd.f32 %v489_v5, %v178_v9  ;;  %182 = vadd.xlane.f32.xlu0 %v836_v7  ;;  %v539_v11 = vpop.f32.mrb[3].mxu0  ;;  %v188_v12 = vmul.f32 %v836_v7, %v836_v7  ;;  %v605_v5 = vld [vmem:[#allocation7 + $0x30] sm:$0xff]  }
 0x114   :  { %573 = vmatpush3.bf16.msra.mxu0 %v605_v5 }
 0x115   :  { %190 = vadd.xlane.f32.xlu1 %v188_v12  ;;  %v189_v13 = vmul.f32 %v838_v10, %v838_v10  ;;  %574 = vmatprep.subr.bf16.mxu0 %v716_v0 }
 0x117   :  { %184 = vadd.xlane.f32.xlu0 %v838_v10 }
 0x118   :  { %575 = vmatpush3.bf16.msra.mxu0 %v606_v6 }
 0x119   :  { %192 = vadd.xlane.f32.xlu1 %v189_v13 }
 0x1a0   :  { %v183_v22 = vpop.xlane.xlu0 %182 }
 0x1a1   :  { %v186_v23 = vmul.f32 0.03125, %v183_v22 }
 0x1a2   :  { %v191_v24 = vpop.xlane.xlu1 %190 }
 0x1a3   :  { %v196_v25 = vmul.f32 %v186_v23, %v186_v23  ;;  %v194_v26 = vmul.f32 0.03125, %v191_v24  ;;  %v202_v38 = vsub.f32 %v836_v7, %v186_v23 }
 0x1a4   :  { %v185_v27 = vpop.xlane.xlu0 %184 }
 0x1a5   :  { %v198_v28 = vsub.f32 %v194_v26, %v196_v25  ;;  %v187_v29 = vmul.f32 0.03125, %v185_v27  ;;  %v503_v26 = vld [vmem:[%s904_s7] ss:$0 sm:$0xff]  ;;  %s718_s7 = smov [#allocation8]  }
 0x1a6   :  { %v193_v30 = vpop.xlane.xlu1 %192 }
 0x1a7   :  { %v200_v31 = vmax.f32 %v198_v28, 0.0  ;;  %v197_v32 = vmul.f32 %v187_v29, %v187_v29  ;;  %v195_v33 = vmul.f32 0.03125, %v193_v30  ;;  %v203_v42 = vsub.f32 %v838_v10, %v187_v29  ;;  %v504_v30 = vld [vmem:[%s905_s8] ss:$0 sm:$0xff]  ;;  %s476_s8 = sshll.u32 %s718_s7, 4  ;;  %s477_s8 = int_to_ptr.vmem [resolvable:$true] %s476_s8 }
 0x1a8   :  { %s681_s30 = scalar_lea.vmem %s477_s8, 256  ;;  %p686_p11 = scmp.lt.s32.totalorder %s477_s8, %s477_s8 }
 0x1a9   :  { %v204_v34 = vadd.f32 1e-05, %v200_v31  ;;  %v199_v35 = vsub.f32 %v195_v33, %v197_v32  ;;  %p682_p10 = scmp.ne.s32.totalorder %s477_s8, %s681_s30  ;;  %p687_p12 = scmp.lt.s32.totalorder %s681_s30, %s681_s30 }
 0x1ab   :  { %607 = vrsqrt.f32 %v204_v34  ;;  %v201_v36 = vmax.f32 %v199_v35, 0.0  ;;  %p688_p13 = por %p687_p12, %p686_p11 }
 0x1ad   :  { %v205_v37 = vadd.f32 1e-05, %v201_v36  ;;  %p689_p0 = pnand %p688_p13, %p682_p10 }
 0x1af   :  { %609 = vrsqrt.f32 %v205_v37 }
 0x1b5   :  { %v608_v39 = vpop.eup %607 }
 0x1b6   :  { %v208_v41 = vmul.f32 %v608_v39, %v202_v38  ;;  %v505_v39 = vld [vmem:[%s907_s10] ss:$0 sm:$0xff] }
 0x1b8   :  { %v216_v43 = vmul.f32 %v492_v40, %v208_v41 }
 0x1b9   :  { %v610_v44 = vpop.eup %609 }
 0x1ba   :  { %v209_v46 = vmul.f32 %v610_v44, %v203_v42  ;;  %v224_v48 = vadd.f32 %v493_v45, %v216_v43 }
 0x1bc   :  { %v217_v47 = vmul.f32 %v492_v40, %v209_v46  ;;  %v226_v50 = vmax.f32 %v224_v48, 0.0 }
 0x1be   :  { %v225_v49 = vadd.f32 %v493_v45, %v217_v47 }
 0x1c0   :  { %v227_v51 = vmax.f32 %v225_v49, 0.0 }
 0x1c2   :  { %v228_v52 = vpack.c.bf16 %v227_v51, %v226_v50 }
 0x1c4   :  { %557 = vmatmul.mubr.bf16.vlgmr.msra.gmra.mrb[0].mxu1 %v228_v52 }
 0x297   :  { %v317_v54 = vpop.f32.mrb[0].mxu1 }
 0x298   :  { %v318_v55 = vadd.f32 %v494_v53, %v317_v54  ;;  %v558_v56 = vpop.f32.mrb[1].mxu1 }
 0x299   :  { %v320_v57 = vpop.f32.mrb[2].mxu1 }
 0x29a   :  { %v321_v58 = vadd.f32 %v494_v53, %v320_v57  ;;  %324 = vadd.xlane.f32.xlu0 %v318_v55  ;;  %v559_v59 = vpop.f32.mrb[3].mxu1  ;;  %v330_v60 = vmul.f32 %v318_v55, %v318_v55 }
 0x29c   :  { %326 = vadd.xlane.f32.xlu1 %v321_v58  ;;  %v331_v61 = vmul.f32 %v321_v58, %v321_v58 }
 0x29e   :  { %332 = vadd.xlane.f32.xlu0 %v330_v60 }
 0x2a0   :  { %334 = vadd.xlane.f32.xlu1 %v331_v61 }
 0x327   :  { %v325_v8 = vpop.xlane.xlu0 %324 }
 0x328   :  { %v328_v9 = vmul.f32 0.03125, %v325_v8 }
 0x329   :  { %v327_v11 = vpop.xlane.xlu1 %326 }
 0x32a   :  { %v329_v12 = vmul.f32 0.03125, %v327_v11  ;;  %v338_v14 = vmul.f32 %v328_v9, %v328_v9  ;;  %v344_v0 = vsub.f32 %v318_v55, %v328_v9 }
 0x32b   :  { %v333_v13 = vpop.xlane.xlu0 %332 }
 0x32c   :  { %v336_v15 = vmul.f32 0.03125, %v333_v13  ;;  %v339_v17 = vmul.f32 %v329_v12, %v329_v12  ;;  %v345_v27 = vsub.f32 %v321_v58, %v329_v12 }
 0x32d   :  { %v335_v16 = vpop.xlane.xlu1 %334 }
 0x32e   :  { %v340_v18 = vsub.f32 %v336_v15, %v338_v14  ;;  %v337_v19 = vmul.f32 0.03125, %v335_v16 }
 0x330   :  { %v342_v20 = vmax.f32 %v340_v18, 0.0  ;;  %v341_v21 = vsub.f32 %v337_v19, %v339_v17 }
 0x332   :  { %v346_v22 = vadd.f32 1e-05, %v342_v20  ;;  %v343_v23 = vmax.f32 %v341_v21, 0.0 }
 0x334   :  { %611 = vrsqrt.f32 %v346_v22  ;;  %v347_v24 = vadd.f32 1e-05, %v343_v23 }
 0x336   :  { %613 = vrsqrt.f32 %v347_v24 }
 0x33e   :  { %v612_v25 = vpop.eup %611 }
 0x33f   :  { %v350_v28 = vmul.f32 %v612_v25, %v344_v0 }
 0x340   :  { %v614_v29 = vpop.eup %613 }
 0x341   :  { %v351_v31 = vmul.f32 %v614_v29, %v345_v27  ;;  %v358_v32 = vmul.f32 %v503_v26, %v350_v28 }
 0x343   :  { %v359_v33 = vmul.f32 %v503_v26, %v351_v31  ;;  %v366_v34 = vadd.f32 %v504_v30, %v358_v32 }
 0x345   :  { %v367_v35 = vadd.f32 %v504_v30, %v359_v33  ;;  %v368_v36 = vmax.f32 %v366_v34, 0.0 }
 0x347   :  { %v369_v37 = vmax.f32 %v367_v35, 0.0 }
 0x349   :  { %v370_v38 = vpack.c.bf16 %v369_v37, %v368_v36 }
 0x34b   :  { %577 = vmatmul.mubr.bf16.vlgmr.msra.gmra.mrb[4].mxu0 %v370_v38 }
 0x41e   :  { %v459_v40 = vpop.f32.mrb[4].mxu0 }
 0x41f   :  { %v460_v41 = vadd.f32 %v505_v39, %v459_v40  ;;  %v578_v42 = vpop.f32.mrb[5].mxu0 }
 0x420   :  { %v462_v43 = vpop.f32.mrb[6].mxu0 }
 0x421   :  { %v466_v44 = vadd.f32 %v460_v41, %v836_v7  ;;  %v463_v45 = vadd.f32 %v505_v39, %v462_v43  ;;  %v579_v46 = vpop.f32.mrb[7].mxu0 }
 0x423   :  { %v467_v47 = vadd.f32 %v463_v45, %v838_v10  ;;  %469 = vst.msk [vmem:[#allocation8] sm:$0xff] %vm468_vm2, %v466_v44 }
 0x425   :  { %470 = vst.msk [vmem:[#allocation8 + $0x8] sm:$0xff] %vm468_vm2, %v467_v47 }
 0x426   :  { %692 = shalt.err (!%p689_p0)
}
 0x427   :  { %s693_s14 = scalar_lea.hbm %s908_s11, 256 }
 0x428   :  { %p694_p1 = scmp.ne.s32.totalorder %s908_s11, %s693_s14  ;;  %p697_p2 = scmp.lt.u32.totalorder %s693_s14, %s908_s11 }
 0x42a   :  { %p699_p3 = pnand %p697_p2, %p694_p1 }
 0x42c   :  { %702 = shalt.err (!%p699_p3)
}
 0x42d   :  { %482 = dma.vmem_to_hbm [thread:$0]  %s477_s8, 256, %s908_s11, [#allocation4], %s713_s5, %s713_s5, %s714_s18  }
 0x42e   :  { %707 = dma.done.wait [#allocation4], 256  }
 0x42f   :  { %708 = vsyncadd [#allocation4], 4294967040 }
 0x430   :  { %486 = vsyncpa [#allocation3], 1 }
 0x431   :  { %487 = vsyncpa [#allocation6], 1 }
 0x432   :  { %488 = vsyncpa [#allocation4], 1 }

</bundles_post_ra>
